<compile_context>
chip_gen: v6e
topology: v6e:2x2x1
jax: 0.10.0
libtpu: 0.0.40
codegen_flags: <defaults>
</compile_context>

<pallas_src>
import numpy as np
import jax
import jax.numpy as jnp
from jax.experimental import pallas as pl
from jax.experimental.pallas import tpu as pltpu


# ----------------------------------------------------------------------------
# Deterministic mel filterbank (replicates librosa.filters.mel defaults:
# htk=False (Slaney mel scale), norm='slaney', fmin=0, fmax=sr/2).
# Host-side NumPy glue; not part of the hot path.
# ----------------------------------------------------------------------------
def _hz_to_mel(freqs):
    freqs = np.asarray(freqs, dtype=np.float64)
    f_sp = 200.0 / 3
    mels = freqs / f_sp
    min_log_hz = 1000.0
    min_log_mel = min_log_hz / f_sp
    logstep = np.log(6.4) / 27.0
    log_t = freqs >= min_log_hz
    mels = np.where(
        log_t,
        min_log_mel + np.log(np.maximum(freqs, 1e-10) / min_log_hz) / logstep,
        mels,
    )
    return mels


def _mel_to_hz(mels):
    mels = np.asarray(mels, dtype=np.float64)
    f_sp = 200.0 / 3
    freqs = f_sp * mels
    min_log_hz = 1000.0
    min_log_mel = min_log_hz / f_sp
    logstep = np.log(6.4) / 27.0
    log_t = mels >= min_log_mel
    freqs = np.where(log_t, min_log_hz * np.exp(logstep * (mels - min_log_mel)), freqs)
    return freqs


def mel_filterbank(sample_rate: int, n_fft: int, n_mels: int) -> np.ndarray:
    fmin, fmax = 0.0, sample_rate / 2.0
    n_freqs = n_fft // 2 + 1
    fftfreqs = np.linspace(0.0, sample_rate / 2.0, n_freqs)

    mel_pts = np.linspace(_hz_to_mel(fmin), _hz_to_mel(fmax), n_mels + 2)
    mel_f = _mel_to_hz(mel_pts)

    fdiff = np.diff(mel_f)
    ramps = mel_f.reshape(-1, 1) - fftfreqs.reshape(1, -1)

    weights = np.zeros((n_mels, n_freqs), dtype=np.float64)
    for i in range(n_mels):
        lower = -ramps[i] / fdiff[i]
        upper = ramps[i + 2] / fdiff[i + 1]
        weights[i] = np.maximum(0.0, np.minimum(lower, upper))

    # Slaney-style area normalization.
    enorm = 2.0 / (mel_f[2 : n_mels + 2] - mel_f[:n_mels])
    weights *= enorm[:, None]
    return weights.astype(np.float32)


# ----------------------------------------------------------------------------
# Pallas kernel: one (batch-block, time-tile) grid step computes
#   o[i, M, TT] = mel[M, F] @ x[i, F, TT]   for i in [0, BB)   (MXU, f32 acc)
# ----------------------------------------------------------------------------
def _melscale_kernel(x_ref, mel_ref, o_ref):
    # x_ref:   (BB, F, TT)  batch-block of time tiles
    # mel_ref: (M, F)       mel filterbank, VMEM-resident across the whole grid
    # o_ref:   (BB, M, TT)  lane-dense output tiles
    w = mel_ref[...]
    for i in range(x_ref.shape[0]):  # static, small (<= 8)
        o_ref[i, :, :] = jnp.dot(
            w, x_ref[i, :, :], preferred_element_type=jnp.float32
        ).astype(o_ref.dtype)


def _round_up(n: int, m: int) -> int:
    return ((n + m - 1) // m) * m


def _round_down(n: int, m: int) -> int:
    return (n // m) * m


def mel_scale(x: jax.Array, mel: jax.Array, *, max_tt: int = 4096) -> jax.Array:
    """y = einsum('bft,mf->bmt', x, mel) via a Pallas TPU kernel.

    Args:
      x:      (B, F, T) spectrogram. bf16 input halves the dominant HBM read.
      mel:    (M, F) mel filterbank (cast to x.dtype, mirroring torch `type_as`).
      max_tt: upper cap on the time-tile width (actual tile is VMEM-budget and
              T-aware, always a multiple of 128).
    """
    B, F_, T = x.shape
    M, F2 = mel.shape
    assert F_ == F2, "freq-bin mismatch between x and mel filterbank"

    mel = mel.astype(x.dtype)  # torch: mel.type_as(x)

    # Tiny time axes: a Pallas dispatch is pure launch overhead; let XLA fuse it.
    # f32 accumulation for numerical parity with the kernel path.
    if T < 128:
        y = jnp.einsum("bft,mf->bmt", x, mel, preferred_element_type=jnp.float32)
        return y.astype(x.dtype)

    itemsize = jnp.dtype(x.dtype).itemsize

    # Generation-aware VMEM budget (v7x: 64 MiB physical, v5e/v6e: 128 MiB).
    try:
        vmem_cap = int(pltpu.get_tpu_info().vmem_capacity_bytes)
    except Exception:  # pragma: no cover - conservative fallback (v7x-sized)
        vmem_cap = 64 << 20
    budget = min(int(vmem_cap * 0.7), 96 << 20)

    T128 = _round_up(T, 128)
    mel_resident = 2 * M * F_ * itemsize  # conservative: double-buffered filterbank

    # Batch-block short-T / large-B workloads so per-step DMA slabs stay large.
    BB = 1
    if T128 <= 1024 and B >= 4:
        BB = min(B, 8)
        # Shrink BB if a full T128-wide tile per batch would blow the budget.
        while BB > 1 and (budget - mel_resident) // (2 * BB * (F_ + M) * itemsize) < 128:
            BB //= 2

    per_col = 2 * BB * (F_ + M) * itemsize  # double-buffered x + out, per time column
    avail_cols = max((budget - mel_resident) // per_col, 128)
    TT = min(_round_down(avail_cols, 128), _round_up(max_tt, 128), T128)
    TT = max(TT, 128)

    grid = (pl.cdiv(B, BB), pl.cdiv(T, TT))

    need = mel_resident + per_col * TT
    vmem_limit = int(min(vmem_cap - (4 << 20), max(32 << 20, need + (2 << 20))))

    cost = pl.CostEstimate(
        flops=2 * B * M * F_ * T,
        transcendentals=0,
        bytes_accessed=itemsize * (B * F_ * T + M * F_ + B * M * T),
    )

    return pl.pallas_call(
        _melscale_kernel,
        out_shape=jax.ShapeDtypeStruct((B, M, T), x.dtype),
        grid=grid,
        in_specs=[
            # Ragged boundary tiles along batch/time are masked by Pallas; only
            # the F (contraction) dim is always full, so OOB garbage never
            # reaches an in-bounds output element.
            pl.BlockSpec((BB, F_, TT), lambda b, t: (b, 0, t)),
            # Constant index_map: mel stays resident in VMEM, DMA'd once.
            pl.BlockSpec((M, F_), lambda b, t: (0, 0)),
        ],
        out_specs=pl.BlockSpec((BB, M, TT), lambda b, t: (b, 0, t)),
        compiler_params=pltpu.CompilerParams(
            dimension_semantics=("parallel", "parallel"),
            vmem_limit_bytes=vmem_limit,
        ),
        cost_estimate=cost,
    )(x, mel)


if __name__ == "__main__":
    # Shapes consistent with the module's forward:
    #   sample_rate=16000, n_fft=64 -> F = 33 freq bins, n_mels=8.
    sample_rate, n_fft, n_mels = 16000, 64, 8
    F_ = n_fft // 2 + 1

    mel_np = mel_filterbank(sample_rate, n_fft, n_mels)  # (M, F)
    mel = jnp.asarray(mel_np)

    key = jax.random.PRNGKey(0)

    def check(B, T, **kw):
        k = jax.random.fold_in(key, B * 100003 + T)
        x = jnp.abs(jax.random.normal(k, (B, F_, T), dtype=jnp.float32))
        y = jax.block_until_ready(mel_scale(x, mel, **kw))
        y_ref = jnp.einsum("bft,mf->bmt", x, mel)
        np.testing.assert_allclose(np.asarray(y), np.asarray(y_ref), rtol=1e-5, atol=1e-5)
        assert y.shape == (B, n_mels, T) and y.dtype == x.dtype

    # 1) Small B, ragged single time tile (masked boundary along T).
    check(2, 300)
    # 2) Multi-tile time axis with ragged tail (forced small tile).
    check(2, 1000, max_tt=256)
    # 3) Short T, large B -> batch-blocked path with ragged batch boundary.
    check(10, 200)
    # 4) Tiny T -> XLA einsum fallback.
    check(2, 64)

    print("KERNEL_OK")
</pallas_src>

<mosaic_0001>
module attributes {stable_mosaic.version = 11 : i64} {
  func.func @_melscale_kernel(%arg0: i32, %arg1: i32, %arg2: memref<1x33x384xf32, #tpu.memory_space<vmem>>, %arg3: memref<8x33xf32, #tpu.memory_space<vmem>>, %arg4: memref<1x8x384xf32, #tpu.memory_space<vmem>>) attributes {dimension_semantics = [#tpu.dimension_semantics<parallel>, #tpu.dimension_semantics<parallel>], iteration_bounds = array<i64: 2, 1>, scalar_prefetch = 0 : i64, scratch_operands = 0 : i64, tpu.core_type = #tpu.core_type<tc>, window_params = [{transform_indices = @transform_0, window_bounds = array<i64: 1, 33, 384>}, {pipeline_mode = #tpu.pipeline_mode<synchronous>, transform_indices = @transform_1, window_bounds = array<i64: 8, 33>}, {transform_indices = @transform_2, window_bounds = array<i64: 1, 8, 384>}]} {
    %c0 = arith.constant 0 : index
    %c0_0 = arith.constant 0 : index
    %0 = vector.load %arg3[%c0, %c0_0] : memref<8x33xf32, #tpu.memory_space<vmem>>, vector<8x33xf32>
    %c0_1 = arith.constant 0 : index
    %c0_2 = arith.constant 0 : index
    %c0_3 = arith.constant 0 : index
    %1 = vector.load %arg2[%c0_1, %c0_2, %c0_3] : memref<1x33x384xf32, #tpu.memory_space<vmem>>, vector<1x33x384xf32>
    %2 = vector.shape_cast %1 : vector<1x33x384xf32> to vector<33x384xf32>
    %cst = arith.constant dense<0.000000e+00> : vector<8x384xf32>
    %3 = tpu.matmul %0, %2, %cst {dimension_numbers = #tpu.dot_dimension_numbers<[1], [0], [0], [1], [0, 0, 1, 1], [], []>} : vector<8x33xf32>, vector<33x384xf32>, vector<8x384xf32> -> vector<8x384xf32>
    %c0_4 = arith.constant 0 : index
    %c0_5 = arith.constant 0 : index
    %c0_6 = arith.constant 0 : index
    %4 = vector.load %arg4[%c0_4, %c0_5, %c0_6] : memref<1x8x384xf32, #tpu.memory_space<vmem>>, vector<1x8x384xf32>
    %5 = vector.shape_cast %4 : vector<1x8x384xf32> to vector<8x384xf32>
    %6 = vector.shape_cast %3 : vector<8x384xf32> to vector<1x8x384xf32>
    tpu.vector_store %arg4[%c0_4, %c0_5, %c0_6], %6 {strides = array<i32>} : memref<1x8x384xf32, #tpu.memory_space<vmem>>, vector<1x8x384xf32>,
    return
  }
  func.func @transform_0(%arg0: i32, %arg1: i32) -> (i32, i32, i32) {
    %c0_i32 = arith.constant 0 : i32
    %c0_i32_0 = arith.constant 0 : i32
    return %arg0, %c0_i32, %arg1 : i32, i32, i32
  }
  func.func @transform_1(%arg0: i32, %arg1: i32) -> (i32, i32) {
    %c0_i32 = arith.constant 0 : i32
    %c0_i32_0 = arith.constant 0 : i32
    %c0_i32_1 = arith.constant 0 : i32
    return %c0_i32, %c0_i32_0 : i32, i32
  }
  func.func @transform_2(%arg0: i32, %arg1: i32) -> (i32, i32, i32) {
    %c0_i32 = arith.constant 0 : i32
    %c0_i32_0 = arith.constant 0 : i32
    return %arg0, %c0_i32, %arg1 : i32, i32, i32
  }
}

</mosaic_0001>

<bundles_post_ra>
// kernel: tpu_custom_call.1
= control target key start
LH: loop header
LB: loop body
LE: loop exit
PB: predicated region body
PF: predicated region fallthrough
CT: control target
= control target key end

     0   :  { %7 = vsyncpa [#allocation3], 0  ;;  %s737_s0 = inlined_call_operand.vmem [shape: f32[2,33,300], index: 0, kind: input, shape index: {}]   ;;  %s738_s1 = inlined_call_operand.vmem [shape: f32[8,33], index: 1, kind: input, shape index: {}]   ;;  %s739_s2 = inlined_call_operand.hbm [shape: f32[2,8,300], index: 2, kind: output, shape index: {}]  }
   0x1   :  { %9 = vsyncpa [#allocation3 + $0x1], 0  ;;  %s629_s9 = smov 0   ;;  %s631_s10 = smov 0  }
   0x2   :  { %s633_s11 = smov 0   ;;  %s635_s12 = smov 0  }
   0x3   :  { %s637_s13 = smov 0   ;;  %s639_s14 = smov 0  }
   0x4 LB: > { %s440_s15 = sadd.s32 4294967295, %s609_s14   ;;  %s441_s16 = sadd.s32 4294967294, %s609_s14   ;;  %s609_s14 = sphi %s639_s14, %s15_s14   ;;  %s605_s13 = sphi %s637_s13, %s746_s13   ;;  %s601_s12 = sphi %s635_s12, %s745_s12   ;;  %s597_s11 = sphi %s633_s11, %s744_s11   ;;  %s593_s10 = sphi %s631_s10, %s743_s10   ;;  %s589_s9 = sphi %s629_s9, %s742_s9  }
   0x5   : > { %s27_s17 = sadd.s32 1, %s605_s13  ;;  %s85_s18 = sadd.s32 1, %s597_s11 }
   0x6   : > { %p29_p0 = scmp.ge.s32.totalorder %s27_s17, 2  ;;  %p95_p1 = scmp.ne.s32.totalorder %s597_s11, %s593_s10 }
   0x7   : > { %p96_p2 = scmp.eq.s32.totalorder %s440_s15, 1  ;;  %p101_p3 = scmp.ne.s32.totalorder %s593_s10, %s589_s9 }
   0x8   : > { %s748_s17 = smov (%p29_p0, %s27_s17), 0  ;;  %p102_p5 = scmp.eq.s32.totalorder %s441_s16, 1 }
   0x9   : > { %p669_p4 = por %p96_p2, %p95_p1  ;;  %s80_s20 = ssub.s32 %s605_s13, %s748_s17 }
   0xa   : > { %p444_p6 = scmp.ge.s32.totalorder %s609_s14, 1  ;;  %p83_p7 = scmp.eq.s32.totalorder %s80_s20, 0 }
   0xb   : > { %p676_p8 = por %p102_p5, %p101_p3  ;;  %p136_p9 = scmp.lt.s32.totalorder %s609_s14, 3 }
   0xc   : > { %s682_s22 = scalar_select %p83_p7, %s597_s11, %s85_s18  }
   0xd   : > { %p137_p10 = pnand %p444_p6, %p136_p9 }
   0xe   : > { %p163_p11 = scmp.lt.s32.totalorder (!%p137_p10), %s601_s12, 1  ;;  %s159_s30 = sand.u32 (!%p137_p10), 1, %s593_s10  }
   0xf   : > { %140 = sbr.rel (%p137_p10) target bundleno = 244 (0xf4), region = 28  ;;  %s348_s16 = scalar_lea.sflag (!%p137_p10), [#allocation3], %s159_s30 }
  0x10   : > { %s473_s3 = smul.u32 (!%p137_p10), 24, %s159_s30 }
  0x11   : > { %s475_s4 = smul.u32 (!%p137_p10), 384, %s601_s12 }
  0x12   : > { %s161_s5 = scalar_lea.vmem (!%p137_p10), [#allocation2], %s473_s3 }
  0x13   : > { %s364_s6 = sshll.u32 (!%p137_p10), %s161_s5, 4  ;;  %s697_s15 = scalar_lea.hbm (!%p137_p10), %s739_s2, %s475_s4  ;;  %s365_s6 = int_to_ptr.vmem [resolvable:$true] %s364_s6 }
  0x14   : > { %v611_v0 = vmov 0.0   ;;  %s164_s23 = scalar_select %p163_p11, %s601_s12, 1  ;;  %vm612_vm0 = vmmov 0   ;;  %vm193_vm1 = vcmask 1040384   ;;  %v173_v16 = vld [vmem:[%s738_s1] sm:$0xff]  ;;  %vm189_vm2 = vcmask 269312  }
  0x15   : > { %460 = vmatprep.subr.mxu1 %v611_v0  ;;  %267 = vmatprep.mubr.f32.mxu0 %v611_v0  ;;  %s533_s18 = scalar_lea.vmem %s365_s6, 384  ;;  %s613_s12 = smov [#allocation2]  }
  0x16   : > { %470 = vmatprep.mubr.msk.f32.mxu1 %vm612_vm0, %v611_v0  ;;  %s474_s24 = smul.u32 120, %s164_s23  ;;  %p534_p12 = scmp.ne.s32.totalorder %s365_s6, %s533_s18 }
  0x17   : > { %s537_s20 = sshll.u32 %s613_s12, 4  ;;  %s538_s20 = int_to_ptr.vmem [resolvable:$false] %s537_s20 }
  0x18   : > { %s170_s27 = scalar_lea.vmem %s737_s0, %s474_s24  ;;  %p535_p13 = pnand %p534_p12, %p669_p4 }
  0x19   : > { %v187_v1 = vld [vmem:[%s170_s27 + $0x68] sm:$0x1]  ;;  %v186_v2 = vld [vmem:[%s170_s27 + $0x60] sm:$0x1]  ;;  %v188_v3 = vld [vmem:[%s170_s27 + $0x70] sm:$0x1]  ;;  %p540_p1 = scmp.lt.s32.totalorder %s365_s6, %s538_s20 }
  0x1a   : > { %446 = vmatprep.subr.msk.mxu0 %vm193_vm1, %v187_v1  ;;  %461 = vmatpush3.msk.msra.mxu1 %vm193_vm1, %v188_v3  ;;  %v184_v4 = vld [vmem:[%s170_s27 + $0x50] sm:$0xff]  ;;  %v183_v5 = vld [vmem:[%s170_s27 + $0x48] sm:$0xff]  ;;  %v185_v6 = vld [vmem:[%s170_s27 + $0x58] sm:$0xff]  ;;  %p536_p0 = pneg %p535_p13  ;;  %s539_s23 = scalar_lea.vmem %s538_s20, 768 }
  0x1b   : > { %447 = vmatpush1.msk.msra.mxu0 %vm193_vm1, %v186_v2  ;;  %462 = vmatprep.subr.mxu1 %v611_v0  ;;  %v181_v7 = vld [vmem:[%s170_s27 + $0x38] sm:$0xff]  ;;  %v182_v8 = vld [vmem:[%s170_s27 + $0x40] sm:$0xff]  ;;  %v180_v9 = vld [vmem:[%s170_s27 + $0x30] sm:$0xff]  ;;  %p541_p2 = scmp.lt.s32.totalorder %s539_s23, %s533_s18 }
  0x1c   : > { %227 = vmatprep.subr.mxu0 %v184_v4  ;;  %463 = vmatpush3.msra.mxu1 %v185_v6  ;;  %v178_v10 = vld [vmem:[%s170_s27 + $0x20] sm:$0xff]  ;;  %v179_v11 = vld [vmem:[%s170_s27 + $0x28] sm:$0xff]  ;;  %v177_v12 = vld [vmem:[%s170_s27 + $0x18] sm:$0xff] }
  0x1d   : > { %228 = vmatpush1.msra.mxu0 %v183_v5  ;;  %464 = vmatprep.subr.mxu1 %v611_v0  ;;  %v175_v13 = vld [vmem:[%s170_s27 + $0x8] sm:$0xff]  ;;  %v176_v14 = vld [vmem:[%s170_s27 + $0x10] sm:$0xff]  ;;  %v174_v15 = vld [vmem:[%s170_s27] sm:$0xff]  ;;  %p542_p3 = por %p541_p2, %p540_p1 }
  0x1e   : > { %229 = vmatprep.subr.mxu0 %v181_v7  ;;  %465 = vmatpush3.msra.mxu1 %v182_v8 }
  0x1f   : > { %230 = vmatpush1.msra.mxu0 %v180_v9  ;;  %466 = vmatprep.subr.mxu1 %v611_v0  ;;  %p543_p5 = pnand %p542_p3, %p536_p0 }
  0x20   : > { %231 = vmatprep.subr.mxu0 %v178_v10  ;;  %467 = vmatpush3.msra.mxu1 %v179_v11 }
  0x21   : > { %232 = vmatpush1.msra.mxu0 %v177_v12  ;;  %468 = vmatprep.subr.mxu1 %v611_v0 }
  0x22   : > { %233 = vmatprep.subr.mxu0 %v175_v13  ;;  %469 = vmatpush3.msra.mxu1 %v176_v14 }
  0x23   : > { %234 = vmatpush1.msra.mxu0 %v174_v15  ;;  %471 = vmatmul.mubr.msk.f32.vlgmr.msra.gmra.mxu1 %vm189_vm2, %v173_v16 }
  0x24   : > { %448 = vmatmul.mubr.msk.f32.vlgmr.msra.gmra.mxu0 %vm189_vm2, %v173_v16 }
  0xe3   : > { %v340_v17 = vpop.f32.mrf.mxu1 }
  0xe4   : > { %v269_v18 = vpop.f32.mrf.mxu0  ;;  %346 = vst [vmem:[%s161_s5 + $0x10] sm:$0xff] %v340_v17 }
  0xe5   : > { %344 = vst [vmem:[%s161_s5] sm:$0xff] %v269_v18  ;;  %v472_v19 = vpop.f32.mrf.mxu1 }
  0xe6   : > { %v271_v20 = vpop.f32.mrf.mxu0 }
  0xe7   : > { %345 = vst [vmem:[%s161_s5 + $0x8] sm:$0xff] %v271_v20 }
  0xe8   : > { %546 = shalt.err (!%p543_p5)
}
  0xe9   : > { %s547_s24 = scalar_lea.hbm %s697_s15, 384  ;;  %s551_s27 = scalar_lea.hbm %s739_s2, 768 }
  0xea   : > { %p548_p6 = scmp.ne.s32.totalorder %s697_s15, %s547_s24  ;;  %p552_p10 = scmp.lt.s32.totalorder %s697_s15, %s739_s2 }
  0xeb   : > { %p553_p11 = scmp.lt.s32.totalorder %s551_s27, %s547_s24 }
  0xec   : > { %p549_p7 = pnand %p548_p6, %p669_p4 }
  0xed   : > { %p554_p12 = por %p553_p11, %p552_p10 }
  0xee   : > { %p550_p9 = pneg %p549_p7 }
  0xf0   : > { %p555_p13 = pnand %p554_p12, %p550_p9 }
  0xf2   : > { %558 = shalt.err (!%p555_p13)
}
  0xf3   : > { %476 = dma.vmem_to_hbm [thread:$0]  (%p669_p4), %s365_s6, 384, %s697_s15, %s348_s16  }
  0xf4 PF: > { %p482_p0 = scmp.ge.s32.totalorder %s609_s14, 2  ;;  %s376_s30 = sand.u32 1, %s589_s9  }
  0xf5   : > { %s377_s3 = scalar_lea.sflag [#allocation3], %s376_s30 }
  0xf6   : > { %p479_p1 = pnand %p482_p0, %p676_p8 }
  0xf8   : > { %p480_p2 = pneg %p479_p1 }
  0xfa   : > { %584 = dma.done.wait (%p480_p2), %s377_s3, 384  }
  0xfb   : > { %586 = vsyncadd (%p480_p2), %s377_s3, 4294966912  ;;  %s15_s14 = sadd.s32 1, %s609_s14   ;;  %s742_s9 = smov %s593_s10 }
  0xfc   : > { %p12_p3 = scmp.ge.s32.totalorder %s15_s14, 4   ;;  %s743_s10 = smov %s597_s11 }
  0xfd   : > { %s744_s11 = smov %s682_s22  ;;  %s745_s12 = smov %s605_s13 }
  0xfe   : > { %s746_s13 = smov %s748_s17  ;;  %14 = sbr.rel (!%p12_p3) target bundleno = 4 (0x4), region = 63 }
 0x103   :  { %382 = vsyncpa [#allocation3], 1 }
 0x104   :  { %384 = vsyncpa [#allocation3 + $0x1], 1 }

</bundles_post_ra>
